<compile_context>
chip_gen: v7x
topology: tpu7x:2x2x1
jax: 0.10.0
libtpu: 0.0.40
codegen_flags: <defaults>
</compile_context>

<pallas_src>
import jax
import jax.numpy as jnp
from jax import lax
from jax.experimental import pallas as pl
from jax.experimental.pallas import tpu as pltpu

_LANE = 128
_BLOCK_K_MAX = 512       # contraction tile when feat_dim is too large to keep W resident
_BLOCK_N_TARGET = 512    # row-tile target (~85% of HBM roofline per measurements)
_ROW_ALIGN = 8           # sublane alignment for partial row tiles


def _round_up(a, b):
    return (a + b - 1) // b * b


def _vmem_budget_bytes():
    """~75% of physical VMEM, capped at 96 MiB (=> 96 MiB on v5e/v6e, 48 MiB on v7x)."""
    cap = 64 * 2**20
    try:
        info = pltpu.get_tpu_info()
        cap = int(getattr(info, "vmem_capacity_bytes", cap)) or cap
    except Exception:
        pass  # unknown backend / older jax: keep the conservative 64 MiB assumption
    return int(min(cap * 3 // 4, 96 * 2**20))


def _weight_fits_resident(f_rows, e_pad, w_itemsize, budget):
    # Conservative: weight double-buffered + 256-row f32 x tile + 256-row f32 out tile + shift.
    rows = 256
    need = (2 * f_rows * e_pad * w_itemsize
            + 2 * rows * f_rows * 4
            + 2 * rows * e_pad * 4
            + 2 * e_pad * 4)
    return need <= budget


def _embed_branch_kernel_resident(x_ref, w_ref, shift_ref, o_ref):
    """Single-K-step path: full folded weight is VMEM-resident; grid = (row tiles,)."""
    z = jnp.dot(x_ref[...].astype(w_ref.dtype), w_ref[...],
                preferred_element_type=jnp.float32)
    z = jnp.maximum(z + shift_ref[...], 0.0)            # folded bias/BN shift, then ReLU
    # Dropout(p=0.5) is the identity in eval mode.
    # TODO(synk): training-mode dropout mask / BN batch-statistic updates not implemented.
    ss = jnp.sum(z * z, axis=-1, keepdims=True)
    # F.normalize: x / max(||x||, 1e-12) == x * rsqrt(max(||x||^2, 1e-24)); rsqrt -> EUP.
    o_ref[...] = (z * lax.rsqrt(jnp.maximum(ss, 1e-24))).astype(o_ref.dtype)


def _embed_branch_kernel_ktiled(x_ref, w_ref, shift_ref, o_ref):
    """K-tiled fallback: grid = (row tiles [parallel], K tiles [arbitrary, last]).

    Accumulates directly into the f32 output tile (constant block index across k), so no
    extra VMEM scratch and no zero-init store.
    """
    k = pl.program_id(1)
    part = jnp.dot(x_ref[...].astype(w_ref.dtype), w_ref[...],
                   preferred_element_type=jnp.float32)

    @pl.when(k == 0)
    def _first():
        o_ref[...] = part

    @pl.when(k != 0)
    def _rest():
        o_ref[...] += part

    @pl.when(k == pl.num_programs(1) - 1)
    def _epilogue():
        z = jnp.maximum(o_ref[...] + shift_ref[...], 0.0)
        ss = jnp.sum(z * z, axis=-1, keepdims=True)
        o_ref[...] = z * lax.rsqrt(jnp.maximum(ss, 1e-24))


def fold_embed_branch_params(w, b, gamma, beta, running_mean, running_var, *,
                             eps=1e-5, matmul_dtype=jnp.bfloat16, force_k_tiled=False):
    """One-time host-side fold of Linear + BatchNorm1d(eval) into (W', shift').

    Returns:
      w_folded: (F_pad, E_pad) matmul_dtype = W.T * bn_scale.  E_pad % 128 == 0 (lane-dense
                output).  F is left unpadded when the folded weight fits VMEM-resident
                (single-K-step kernel); otherwise it is zero-padded to a multiple of 512.
      shift:    (1, E_pad) float32 = (b - running_mean) * bn_scale + beta.
    """
    E, F = w.shape  # PyTorch nn.Linear weight is (out_features, in_features)
    scale = gamma.astype(jnp.float32) / jnp.sqrt(running_var.astype(jnp.float32) + eps)
    shift = (b.astype(jnp.float32) - running_mean.astype(jnp.float32)) * scale \
            + beta.astype(jnp.float32)
    w_folded = w.astype(jnp.float32).T * scale[None, :]                       # (F, E)

    e_pad = _round_up(E, _LANE)
    itemsize = jnp.dtype(matmul_dtype).itemsize
    resident = (not force_k_tiled) and _weight_fits_resident(F, e_pad, itemsize,
                                                             _vmem_budget_bytes())
    f_pad = F if resident else _round_up(F, _BLOCK_K_MAX)

    w_folded = jnp.pad(w_folded, ((0, f_pad - F), (0, e_pad - E))).astype(matmul_dtype)
    shift = jnp.pad(shift, (0, e_pad - E)).reshape(1, e_pad)
    return w_folded, shift


def embed_branch_forward(x, w_folded, shift, embedding_dim, *, out_dtype=None):
    N, F = x.shape
    f_pad, e_pad = w_folded.shape
    assert f_pad >= F and e_pad >= embedding_dim
    out_dtype = jnp.dtype(out_dtype) if out_dtype is not None else x.dtype

    budget = _vmem_budget_bytes()
    w_itemsize = jnp.dtype(w_folded.dtype).itemsize
    x_itemsize = jnp.dtype(x.dtype).itemsize

    # fold_embed_branch_params leaves F unpadded (f_pad == F) only when the whole folded
    # weight is VMEM-resident -> single K step, constant weight block index, no accumulator.
    single_k = (f_pad == F)
    pallas_out_dtype = out_dtype if single_k else jnp.float32   # f32 needed to accumulate
    out_itemsize = jnp.dtype(pallas_out_dtype).itemsize

    if single_k:
        block_k = f_pad
    else:
        block_k = min(_BLOCK_K_MAX, f_pad)
        while f_pad % block_k != 0:           # f_pad is a multiple of 128, so this terminates
            block_k //= 2

    def _usage(bn, bk):
        return (2 * bn * bk * x_itemsize            # x tile (double-buffered, native dtype)
                + 2 * bk * e_pad * w_itemsize       # weight tile
                + 2 * bn * e_pad * out_itemsize     # output tile
                + 2 * e_pad * 4)                    # shift

    block_n = N if N <= _BLOCK_N_TARGET else _BLOCK_N_TARGET
    # Shrink the contraction tile before the row tile (keeps the MXU M dimension healthy).
    while (not single_k) and block_k > _LANE and _usage(block_n, block_k) > budget:
        block_k //= 2
    while block_n > _ROW_ALIGN and _usage(block_n, block_k) > budget:
        block_n = max(_ROW_ALIGN, (block_n // 2) // _ROW_ALIGN * _ROW_ALIGN)
    n_pad = N if block_n == N else _round_up(N, block_n)

    # Give the second TensorCore (v7x) something to do when a single row tile would cover N.
    if N >= 16 and n_pad // block_n < 2:
        half = _round_up((N + 1) // 2, _ROW_ALIGN)
        if half < block_n:
            block_n = half
            n_pad = _round_up(N, block_n)

    # Host-side zero-pad only when shapes are misaligned (padded zeros contribute exactly 0,
    # so the L2 norm of real rows is unchanged and no NaN can leak in from unpadded tails).
    if n_pad != N or f_pad != F:
        x_in = jnp.pad(x, ((0, n_pad - N), (0, f_pad - F)))
    else:
        x_in = x

    cost = pl.CostEstimate(
        flops=2 * n_pad * f_pad * e_pad,
        transcendentals=n_pad,                       # one rsqrt per row
        bytes_accessed=(n_pad * f_pad * x_itemsize + f_pad * e_pad * w_itemsize
                        + e_pad * 4 + n_pad * e_pad * out_itemsize),
    )
    compiler_params = pltpu.CompilerParams(
        dimension_semantics=("parallel",) if single_k else ("parallel", "arbitrary"),
        vmem_limit_bytes=int(budget),
    )

    if single_k:
        grid = (n_pad // block_n,)
        kernel = _embed_branch_kernel_resident
        in_specs = [
            pl.BlockSpec((block_n, f_pad), lambda i: (i, 0)),   # x tile (only streamed input)
            pl.BlockSpec((f_pad, e_pad), lambda i: (0, 0)),     # folded weight (VMEM-resident)
            pl.BlockSpec((1, e_pad), lambda i: (0, 0)),         # folded shift
        ]
        out_specs = pl.BlockSpec((block_n, e_pad), lambda i: (i, 0))
    else:
        grid = (n_pad // block_n, f_pad // block_k)
        kernel = _embed_branch_kernel_ktiled
        in_specs = [
            pl.BlockSpec((block_n, block_k), lambda i, k: (i, k)),
            pl.BlockSpec((block_k, e_pad), lambda i, k: (k, 0)),
            pl.BlockSpec((1, e_pad), lambda i, k: (0, 0)),
        ]
        out_specs = pl.BlockSpec((block_n, e_pad), lambda i, k: (i, 0))

    out = pl.pallas_call(
        kernel,
        out_shape=jax.ShapeDtypeStruct((n_pad, e_pad), pallas_out_dtype),
        grid_spec=pltpu.PrefetchScalarGridSpec(
            num_scalar_prefetch=0,
            grid=grid,
            in_specs=in_specs,
            out_specs=out_specs,
        ),
        compiler_params=compiler_params,
        cost_estimate=cost,
    )(x_in, w_folded, shift)

    if n_pad != N or e_pad != embedding_dim:
        out = out[:N, :embedding_dim]
    if out.dtype != out_dtype:
        out = out.astype(out_dtype)
    return out


def reference_forward(x, w, b, gamma, beta, running_mean, running_var, eps=1e-5):
    z = x @ w.T + b
    z = (z - running_mean) / jnp.sqrt(running_var + eps) * gamma + beta
    z = jnp.maximum(z, 0.0)
    norm = jnp.sqrt(jnp.sum(z * z, axis=-1, keepdims=True))
    return z / jnp.maximum(norm, 1e-12)


if __name__ == "__main__":
    feat_dim, embedding_dim, N = 32, 64, 8

    key = jax.random.PRNGKey(0)
    kx, kw, kb, kg, kbe, km, kv, kx2, kw2 = jax.random.split(key, 9)

    x = jax.random.normal(kx, (N, feat_dim), dtype=jnp.float32)
    w = jax.random.normal(kw, (embedding_dim, feat_dim), dtype=jnp.float32) * 0.1
    b = jax.random.normal(kb, (embedding_dim,), dtype=jnp.float32) * 0.1
    gamma = 1.0 + 0.1 * jax.random.normal(kg, (embedding_dim,), dtype=jnp.float32)
    beta = 0.1 * jax.random.normal(kbe, (embedding_dim,), dtype=jnp.float32)
    running_mean = 0.1 * jax.random.normal(km, (embedding_dim,), dtype=jnp.float32)
    running_var = jnp.abs(1.0 + 0.1 * jax.random.normal(kv, (embedding_dim,),
                                                        dtype=jnp.float32))

    ref = reference_forward(x, w, b, gamma, beta, running_mean, running_var)

    # 1) Strict correctness: f32 matmul operands, weight-resident single-K-step path.
    w32, s32 = fold_embed_branch_params(w, b, gamma, beta, running_mean, running_var,
                                        matmul_dtype=jnp.float32)
    out32 = jax.block_until_ready(embed_branch_forward(x, w32, s32, embedding_dim))
    assert out32.shape == (N, embedding_dim)
    assert jnp.allclose(out32, ref, atol=2e-5, rtol=2e-5), "f32 kernel mismatch vs reference"

    # 2) Performance default: bf16 matmul operands (MXU-native), f32 accumulation + epilogue.
    wbf, sbf = fold_embed_branch_params(w, b, gamma, beta, running_mean, running_var,
                                        matmul_dtype=jnp.bfloat16)
    outbf = jax.block_until_ready(embed_branch_forward(x, wbf, sbf, embedding_dim))
    assert outbf.shape == (N, embedding_dim)
    assert jnp.allclose(outbf, ref, atol=2e-2, rtol=2e-2), "bf16 kernel mismatch vs reference"

    # 3) Exercise the K-tiled fallback path (forced; feat_dim not a multiple of 512).
    feat2 = 600
    x2 = jax.random.normal(kx2, (N, feat2), dtype=jnp.float32)
    w2 = jax.random.normal(kw2, (embedding_dim, feat2), dtype=jnp.float32) * 0.05
    ref2 = reference_forward(x2, w2, b, gamma, beta, running_mean, running_var)
    wk, sk = fold_embed_branch_params(w2, b, gamma, beta, running_mean, running_var,
                                      matmul_dtype=jnp.float32, force_k_tiled=True)
    outk = jax.block_until_ready(embed_branch_forward(x2, wk, sk, embedding_dim))
    assert outk.shape == (N, embedding_dim)
    assert jnp.allclose(outk, ref2, atol=3e-2, rtol=3e-2), "K-tiled kernel mismatch vs reference"

    print("KERNEL_OK")
</pallas_src>

<mosaic_0001>
module attributes {stable_mosaic.version = 11 : i64} {
  func.func @_embed_branch_kernel_resident(%arg0: i32, %arg1: memref<8x32xf32, #tpu.memory_space<vmem>>, %arg2: memref<32x128xf32, #tpu.memory_space<vmem>>, %arg3: memref<1x128xf32, #tpu.memory_space<vmem>>, %arg4: memref<8x128xf32, #tpu.memory_space<vmem>>) attributes {dimension_semantics = [#tpu.dimension_semantics<parallel>], iteration_bounds = array<i64: 1>, scalar_prefetch = 0 : i64, scratch_operands = 0 : i64, tpu.core_type = #tpu.core_type<tc>, window_params = [{transform_indices = @transform_0, window_bounds = array<i64: 8, 32>}, {pipeline_mode = #tpu.pipeline_mode<synchronous>, transform_indices = @transform_1, window_bounds = array<i64: 32, 128>}, {pipeline_mode = #tpu.pipeline_mode<synchronous>, transform_indices = @transform_2, window_bounds = array<i64: 1, 128>}, {transform_indices = @transform_3, window_bounds = array<i64: 8, 128>}]} {
    %c0 = arith.constant 0 : index
    %c0_0 = arith.constant 0 : index
    %0 = vector.load %arg1[%c0, %c0_0] : memref<8x32xf32, #tpu.memory_space<vmem>>, vector<8x32xf32>
    %c0_1 = arith.constant 0 : index
    %c0_2 = arith.constant 0 : index
    %1 = vector.load %arg2[%c0_1, %c0_2] : memref<32x128xf32, #tpu.memory_space<vmem>>, vector<32x128xf32>
    %cst = arith.constant dense<0.000000e+00> : vector<8x128xf32>
    %2 = tpu.matmul %0, %1, %cst {dimension_numbers = #tpu.dot_dimension_numbers<[1], [0], [0], [1], [0, 0, 1, 1], [], []>} : vector<8x32xf32>, vector<32x128xf32>, vector<8x128xf32> -> vector<8x128xf32>
    %c0_3 = arith.constant 0 : index
    %c0_4 = arith.constant 0 : index
    %3 = vector.load %arg3[%c0_3, %c0_4] : memref<1x128xf32, #tpu.memory_space<vmem>>, vector<1x128xf32>
    %4 = vector.broadcast %3 : vector<1x128xf32> to vector<8x128xf32>
    %5 = arith.addf %2, %4 : vector<8x128xf32>
    %cst_5 = arith.constant 0.000000e+00 : f32
    %6 = vector.broadcast %cst_5 : f32 to vector<8x128xf32>
    %7 = arith.maximumf %5, %6 : vector<8x128xf32>
    %8 = arith.mulf %7, %7 : vector<8x128xf32>
    %cst_6 = arith.constant dense<0.000000e+00> : vector<8xf32>
    %9 = vector.multi_reduction <add>, %8, %cst_6 [1] : vector<8x128xf32> to vector<8xf32>
    %10 = vector.shape_cast %9 : vector<8xf32> to vector<8x1xf32>
    %cst_7 = arith.constant 1.000000e-24 : f32
    %11 = vector.broadcast %cst_7 : f32 to vector<8x1xf32>
    %12 = arith.maximumf %10, %11 : vector<8x1xf32>
    %13 = math.rsqrt %12 : vector<8x1xf32>
    %14 = vector.broadcast %13 : vector<8x1xf32> to vector<8x128xf32>
    %15 = arith.mulf %7, %14 : vector<8x128xf32>
    %c0_8 = arith.constant 0 : index
    %c0_9 = arith.constant 0 : index
    %16 = vector.load %arg4[%c0_8, %c0_9] : memref<8x128xf32, #tpu.memory_space<vmem>>, vector<8x128xf32>
    tpu.vector_store %arg4[%c0_8, %c0_9], %15 {strides = array<i32>} : memref<8x128xf32, #tpu.memory_space<vmem>>, vector<8x128xf32>,
    return
  }
  func.func @transform_0(%arg0: i32) -> (i32, i32) {
    %c0_i32 = arith.constant 0 : i32
    %c0_i32_0 = arith.constant 0 : i32
    return %arg0, %c0_i32 : i32, i32
  }
  func.func @transform_1(%arg0: i32) -> (i32, i32) {
    %c0_i32 = arith.constant 0 : i32
    %c0_i32_0 = arith.constant 0 : i32
    %c0_i32_1 = arith.constant 0 : i32
    return %c0_i32, %c0_i32_0 : i32, i32
  }
  func.func @transform_2(%arg0: i32) -> (i32, i32) {
    %c0_i32 = arith.constant 0 : i32
    %c0_i32_0 = arith.constant 0 : i32
    %c0_i32_1 = arith.constant 0 : i32
    return %c0_i32, %c0_i32_0 : i32, i32
  }
  func.func @transform_3(%arg0: i32) -> (i32, i32) {
    %c0_i32 = arith.constant 0 : i32
    %c0_i32_0 = arith.constant 0 : i32
    return %arg0, %c0_i32 : i32, i32
  }
}

</mosaic_0001>

<bundles_post_ra>
// kernel: tpu_custom_call.1
= control target key start
LH: loop header
LB: loop body
LE: loop exit
PB: predicated region body
PF: predicated region fallthrough
CT: control target
= control target key end

     0   :  { %8 = vsyncpa [#allocation3], 0  ;;  %s331_s0 = inlined_call_operand.hbm [shape: f32[8,32], index: 0, kind: input, shape index: {}]   ;;  %s332_s1 = inlined_call_operand.hbm [shape: f32[32,128], index: 1, kind: input, shape index: {}]   ;;  %s333_s2 = inlined_call_operand.vmem [shape: f32[1,128], index: 2, kind: input, shape index: {}]   ;;  %s334_s3 = inlined_call_operand.hbm [shape: f32[8,128], index: 3, kind: output, shape index: {}]  }
   0x1   :  { %9 = vsyncpa [#allocation6], 0 }
   0x2   :  { %10 = vsyncpa [#allocation4], 0  ;;  %s257_s12 = smov [#allocation2]   ;;  %s258_s14 = smov [#allocation5]  }
   0x3   :  { %s17_s13 = sshll.u32 %s257_s12, 4  ;;  %s26_s15 = sshll.u32 %s258_s14, 4  ;;  %s18_s13 = int_to_ptr.vmem [resolvable:$true] %s17_s13  ;;  %s285_s15 = int_to_ptr.vmem [resolvable:$true] %s26_s15 }
   0x4   :  { %s185_s18 = scalar_lea.hbm %s331_s0, 128 }
   0x5   :  { %p186_p0 = scmp.ne.s32.totalorder %s331_s0, %s185_s18  ;;  %p189_p1 = scmp.lt.u32.totalorder %s185_s18, %s331_s0 }
   0x7   :  { %p191_p2 = pnand %p189_p1, %p186_p0 }
   0x9   :  { %194 = shalt.err (!%p191_p2)
}
   0xa   :  { %s195_s23 = scalar_lea.vmem %s18_s13, 128  ;;  %p200_p4 = scmp.lt.s32.totalorder %s18_s13, %s18_s13 }
   0xb   :  { %p196_p3 = scmp.ne.s32.totalorder %s18_s13, %s195_s23  ;;  %p201_p5 = scmp.lt.s32.totalorder %s195_s23, %s195_s23 }
   0xd   :  { %p202_p6 = por %p201_p5, %p200_p4 }
   0xf   :  { %p203_p7 = pnand %p202_p6, %p196_p3 }
  0x11   :  { %206 = shalt.err (!%p203_p7)
}
  0x12   :  { %20 = dma.hbm_to_vmem [thread:$0]  %s331_s0, 128, %s18_s13, [#allocation3]  }
  0x13   :  { %s207_s28 = scalar_lea.hbm %s332_s1, 512 }
  0x14   :  { %p208_p8 = scmp.ne.s32.totalorder %s332_s1, %s207_s28  ;;  %p211_p9 = scmp.lt.u32.totalorder %s207_s28, %s332_s1 }
  0x16   :  { %p213_p10 = pnand %p211_p9, %p208_p8 }
  0x18   :  { %216 = shalt.err (!%p213_p10)
}
  0x19   :  { %s217_s6 = scalar_lea.vmem %s285_s15, 512  ;;  %p222_p12 = scmp.lt.s32.totalorder %s285_s15, %s285_s15 }
  0x1a   :  { %p218_p11 = scmp.ne.s32.totalorder %s285_s15, %s217_s6  ;;  %p223_p13 = scmp.lt.s32.totalorder %s217_s6, %s217_s6 }
  0x1c   :  { %p224_p0 = por %p223_p13, %p222_p12 }
  0x1e   :  { %p225_p1 = pnand %p224_p0, %p218_p11 }
  0x20   :  { %228 = shalt.err (!%p225_p1)
}
  0x21   :  { %s259_s0 = smov 128   ;;  %s260_s7 = smov 8  }
  0x22   :  { %32 = dma.hbm_to_vmem [thread:$0]  %s332_s1, 512, %s285_s15, [#allocation6], %s259_s0, %s259_s0, %s260_s7  }
  0x23   :  { %251 = dma.done.wait [#allocation3], 128  }
  0x24   :  { %252 = vsyncadd [#allocation3], 4294967168 }
  0x25   :  { %253 = dma.done.wait [#allocation6], 512  }
  0x26   :  { %254 = vsyncadd [#allocation6], 4294966784  ;;  %v261_v0 = vmov 0.0|0.0   ;;  %vm262_vm0 = vmmov 0   ;;  %v263_v1 = vmov 0.0   ;;  %v42_v2 = vld [vmem:[#allocation5] sm:$0xff] }
  0x27   :  { %169 = vmatprep.subr.bf16.mxu0 %v261_v0  ;;  %166 = vmatprep.mubr.msk.f32.mxu0 %vm262_vm0, %v263_v1  ;;  %v43_v3 = vld [vmem:[#allocation5 + $0x8] sm:$0xff]  ;;  %v44_v4 = vld [vmem:[#allocation5 + $0x10] sm:$0xff]  ;;  %v45_v6 = vld [vmem:[#allocation5 + $0x18] sm:$0xff]  ;;  %vm53_vm1 = vcmask 261120   ;;  %s264_s11 = smov [#allocation7]  }
  0x28   :  { %v170_v5 = vpack.c.bf16 %v43_v3, %v42_v2  ;;  %v173_v7 = vpack.c.bf16 %v45_v6, %v44_v4  ;;  %v41_v8 = vld [vmem:[#allocation2] sm:$0xff]  ;;  %s141_s12 = sshll.u32 %s264_s11, 4  ;;  %s142_s12 = int_to_ptr.vmem [resolvable:$true] %s141_s12 }
  0x29   :  { %v151_v9 = vld [vmem:[%s333_s2] ss:$0 sm:$0xff]  ;;  %s229_s13 = scalar_lea.vmem %s142_s12, 128  ;;  %p234_p3 = scmp.lt.s32.totalorder %s142_s12, %s142_s12 }
  0x2a   :  { %171 = vmatpush3.bf16.msra.mxu0 %v170_v5  ;;  %p230_p2 = scmp.ne.s32.totalorder %s142_s12, %s229_s13  ;;  %p235_p4 = scmp.lt.s32.totalorder %s229_s13, %s229_s13 }
  0x2b   :  { %172 = vmatprep.subr.bf16.mxu0 %v261_v0 }
  0x2c   :  { %p236_p5 = por %p235_p4, %p234_p3 }
  0x2e   :  { %174 = vmatpush3.bf16.msra.mxu0 %v173_v7  ;;  %p237_p6 = pnand %p236_p5, %p230_p2 }
  0x31   :  { %167 = vmatmul.mubr.msk.f32.vlgmr.msra.gmra.mrb[0].mxu0 %vm53_vm1, %v41_v8 }
 0x104   :  { %v123_v10 = vpop.f32.mrb[0].mxu0 }
 0x105   :  { %v124_v11 = vadd.f32 %v151_v9, %v123_v10  ;;  %v168_v12 = vpop.f32.mrb[1].mxu0 }
 0x107   :  { %v127_v13 = vmax.f32 %v124_v11, 0.0 }
 0x109   :  { %v128_v14 = vmul.f32 %v127_v13, %v127_v13 }
 0x10b   :  { %129 = vadd.xlane.f32.xlu0 %v128_v14 }
 0x198   :  { %v130_v15 = vpop.xlane.xlu0 %129 }
 0x199   :  { %v131_v16 = vmax.f32 %v130_v15, 1e-24 }
 0x19b   :  { %183 = vrsqrt.f32 %v131_v16 }
 0x1a5   :  { %v184_v17 = vpop.eup %183 }
 0x1a6   :  { %v133_v18 = vmul.f32 %v184_v17, %v127_v13 }
 0x1a8   :  { %134 = vst [vmem:[#allocation7] sm:$0xff] %v133_v18 }
 0x1a9   :  { %240 = shalt.err (!%p237_p6)
}
 0x1aa   :  { %s241_s15 = scalar_lea.hbm %s334_s3, 128 }
 0x1ab   :  { %p242_p7 = scmp.ne.s32.totalorder %s334_s3, %s241_s15  ;;  %p245_p8 = scmp.lt.u32.totalorder %s241_s15, %s334_s3 }
 0x1ad   :  { %p247_p9 = pnand %p245_p8, %p242_p7 }
 0x1af   :  { %250 = shalt.err (!%p247_p9)
}
 0x1b0   :  { %144 = dma.vmem_to_hbm [thread:$0]  %s142_s12, 128, %s334_s3, [#allocation4]  }
 0x1b1   :  { %255 = dma.done.wait [#allocation4], 128  }
 0x1b2   :  { %256 = vsyncadd [#allocation4], 4294967168 }
 0x1b3   :  { %148 = vsyncpa [#allocation3], 1 }
 0x1b4   :  { %149 = vsyncpa [#allocation6], 1 }
 0x1b5   :  { %150 = vsyncpa [#allocation4], 1 }

</bundles_post_ra>
